<compile_context>
chip_gen: v7x
topology: tpu7x:2x2x1
jax: 0.10.0
libtpu: 0.0.40
codegen_flags: <defaults>
</compile_context>

<pallas_src>
import functools

import jax
import jax.numpy as jnp
import numpy as np
from jax import lax
from jax.experimental import pallas as pl
from jax.experimental.pallas import tpu as pltpu

_EPS = 1e-12                        # torch F.normalize default eps (clamp_min on the norm)
_BYTES_PER_INPUT_BLOCK = 2 << 20    # ~2 MiB per input block -> ~8 MiB double-buffered VMEM
_MAX_ROW_TILE = 2048                # keep per-step granularity reasonable for tiny C


# ----------------------------------------------------------------------------
# Pallas kernel: fused normalize(p) . normalize(z) -> negated, per row.
# ----------------------------------------------------------------------------
def _neg_cosine_kernel(p_ref, z_ref, o_ref, *, eps):
    p = p_ref[...].astype(jnp.float32)
    z = z_ref[...].astype(jnp.float32)
    dot = jnp.sum(p * z, axis=1, keepdims=True)                  # (tb, 1)
    p_norm = jnp.sqrt(jnp.sum(p * p, axis=1, keepdims=True))     # (tb, 1)
    z_norm = jnp.sqrt(jnp.sum(z * z, axis=1, keepdims=True))     # (tb, 1)
    denom = jnp.maximum(p_norm, eps) * jnp.maximum(z_norm, eps)
    res = -dot / denom                                           # (tb, 1)
    # Lane-dense store: relayout the per-row column into one lane-major row
    # (cheap XLU relayout) so the writeback uses full vector stores.
    o_ref[...] = res.reshape(1, -1).astype(o_ref.dtype)


# ----------------------------------------------------------------------------
# Tile selection: VMEM byte budget, not a fixed row cap.
# ----------------------------------------------------------------------------
def _choose_row_tile(B, C, itemsize):
    b_rows = pl.cdiv(B, 8) * 8
    c_pad = pl.cdiv(C, 128) * 128            # VMEM tiles are (8, 128)
    budget_rows = max(8, _BYTES_PER_INPUT_BLOCK // (c_pad * itemsize))
    tb = max(8, min(_MAX_ROW_TILE, (budget_rows // 8) * 8))
    tb = min(tb, b_rows)
    # v7x: make sure there are >=2 grid steps (one per TensorCore) when possible.
    if pl.cdiv(B, tb) < 2 and b_rows >= 16:
        tb = ((b_rows // 2 + 7) // 8) * 8
    return tb


# ----------------------------------------------------------------------------
# Forward implementation (single fused pallas_call, no input padding copies)
# ----------------------------------------------------------------------------
def _neg_cosine_fwd_impl(p, z):
    assert p.ndim == 2 and p.shape == z.shape, (p.shape, z.shape)
    z = lax.stop_gradient(z)   # forward value unchanged; bwd handled by custom_vjp
    B, C = p.shape
    out_dtype = jnp.promote_types(p.dtype, z.dtype)
    in_itemsize = max(jnp.dtype(p.dtype).itemsize, jnp.dtype(z.dtype).itemsize)

    tb = _choose_row_tile(B, C, in_itemsize)
    n_tiles = pl.cdiv(B, tb)

    cost = pl.CostEstimate(
        flops=6 * B * C,
        transcendentals=0,
        bytes_accessed=(jnp.dtype(p.dtype).itemsize + jnp.dtype(z.dtype).itemsize) * B * C
        + n_tiles * tb * jnp.dtype(out_dtype).itemsize,
    )

    out = pl.pallas_call(
        functools.partial(_neg_cosine_kernel, eps=_EPS),
        out_shape=jax.ShapeDtypeStruct((n_tiles, tb), out_dtype),
        grid=(n_tiles,),
        in_specs=[
            pl.BlockSpec((tb, C), lambda i: (i, 0)),
            pl.BlockSpec((tb, C), lambda i: (i, 0)),
        ],
        # Lane-dense output block: one (1, tb) row of results per grid step.
        out_specs=pl.BlockSpec((1, tb), lambda i: (i, 0)),
        compiler_params=pltpu.CompilerParams(dimension_semantics=("parallel",)),
        cost_estimate=cost,
    )(p, z)
    # Rows >= B (ragged last block computed on garbage) are discarded here.
    return out.reshape(-1)[:B]


# ----------------------------------------------------------------------------
# Differentiable public entry point (pallas_call is not differentiable).
# ----------------------------------------------------------------------------
@jax.custom_vjp
def neg_cosine_pallas(p, z):
    """p, z: (B, C). Returns (B,) = -(normalize(p) * normalize(z)).sum(axis=1)."""
    return _neg_cosine_fwd_impl(p, z)


def _neg_cosine_vjp_fwd(p, z):
    return _neg_cosine_fwd_impl(p, z), (p, z)


def _neg_cosine_vjp_bwd(residuals, g):
    # TODO(synk): gradient ignores the (measure-zero) eps-clamp corner where ||p|| < eps.
    p, z = residuals
    p32 = p.astype(jnp.float32)
    z32 = z.astype(jnp.float32)
    pn = jnp.maximum(jnp.sqrt(jnp.sum(p32 * p32, axis=1, keepdims=True)), _EPS)
    zn = jnp.maximum(jnp.sqrt(jnp.sum(z32 * z32, axis=1, keepdims=True)), _EPS)
    ph = p32 / pn
    zh = z32 / zn
    cos = jnp.sum(ph * zh, axis=1, keepdims=True)
    gp = (-(zh - cos * ph) / pn) * g.astype(jnp.float32)[:, None]
    # z is detached in the PyTorch module -> zero cotangent.
    return gp.astype(p.dtype), jnp.zeros_like(z)


neg_cosine_pallas.defvjp(_neg_cosine_vjp_fwd, _neg_cosine_vjp_bwd)


# ----------------------------------------------------------------------------
# Pure-JAX reference (mirrors the PyTorch forward exactly)
# ----------------------------------------------------------------------------
def neg_cosine_ref(p, z, eps=_EPS):
    p_n = p / jnp.maximum(jnp.sqrt(jnp.sum(p * p, axis=1, keepdims=True)), eps)
    z_n = z / jnp.maximum(jnp.sqrt(jnp.sum(z * z, axis=1, keepdims=True)), eps)
    return -jnp.sum(p_n * z_n, axis=1)


# ----------------------------------------------------------------------------
if __name__ == "__main__":
    key = jax.random.PRNGKey(0)
    k1, k2, k3, k4, k5, k6 = jax.random.split(key, 6)

    fwd = jax.jit(neg_cosine_pallas)
    ref = jax.jit(neg_cosine_ref)

    # Case 1: small shapes consistent with the module (batch, feature) projections.
    p = jax.random.normal(k1, (8, 32), jnp.float32)
    z = jax.random.normal(k2, (8, 32), jnp.float32)
    out = jax.block_until_ready(fwd(p, z))
    assert out.shape == (8,), out.shape
    np.testing.assert_allclose(np.asarray(out), np.asarray(ref(p, z)), rtol=1e-6, atol=1e-6)

    # Case 2: ragged batch + non-128-aligned feature dim (exercises edge masking).
    p2 = jax.random.normal(k3, (5, 33), jnp.float32)
    z2 = jax.random.normal(k4, (5, 33), jnp.float32)
    out2 = jax.block_until_ready(fwd(p2, z2))
    assert out2.shape == (5,), out2.shape
    np.testing.assert_allclose(np.asarray(out2), np.asarray(ref(p2, z2)), rtol=1e-6, atol=1e-6)

    # Case 3: multi-tile grid + ragged last block + lane-dense output path.
    p3 = jax.random.normal(k5, (300, 256), jnp.float32)
    z3 = jax.random.normal(k6, (300, 256), jnp.float32)
    out3 = jax.block_until_ready(fwd(p3, z3))
    assert out3.shape == (300,), out3.shape
    np.testing.assert_allclose(np.asarray(out3), np.asarray(ref(p3, z3)), rtol=1e-6, atol=1e-6)

    # Gradient sanity (custom_vjp): grad flows through p only, z is detached.
    gp = jax.block_until_ready(jax.grad(lambda a, b: jnp.sum(neg_cosine_pallas(a, b)))(p, z))
    gp_ref = jax.grad(lambda a, b: jnp.sum(neg_cosine_ref(a, lax.stop_gradient(b))))(p, z)
    np.testing.assert_allclose(np.asarray(gp), np.asarray(gp_ref), rtol=1e-4, atol=1e-5)

    print("KERNEL_OK")
</pallas_src>

<mosaic_0001>
module attributes {stable_mosaic.version = 11 : i64} {
  func.func @_neg_cosine_kernel(%arg0: i32, %arg1: memref<8x32xf32, #tpu.memory_space<vmem>>, %arg2: memref<8x32xf32, #tpu.memory_space<vmem>>, %arg3: memref<1x8xf32, #tpu.memory_space<vmem>>) attributes {dimension_semantics = [#tpu.dimension_semantics<parallel>], iteration_bounds = array<i64: 1>, scalar_prefetch = 0 : i64, scratch_operands = 0 : i64, tpu.core_type = #tpu.core_type<tc>, window_params = [{transform_indices = @transform_0, window_bounds = array<i64: 8, 32>}, {transform_indices = @transform_1, window_bounds = array<i64: 8, 32>}, {transform_indices = @transform_2, window_bounds = array<i64: 1, 8>}]} {
    %c0 = arith.constant 0 : index
    %c0_0 = arith.constant 0 : index
    %0 = vector.load %arg1[%c0, %c0_0] : memref<8x32xf32, #tpu.memory_space<vmem>>, vector<8x32xf32>
    %c0_1 = arith.constant 0 : index
    %c0_2 = arith.constant 0 : index
    %1 = vector.load %arg2[%c0_1, %c0_2] : memref<8x32xf32, #tpu.memory_space<vmem>>, vector<8x32xf32>
    %2 = arith.mulf %0, %1 : vector<8x32xf32>
    %cst = arith.constant dense<0.000000e+00> : vector<8xf32>
    %3 = vector.multi_reduction <add>, %2, %cst [1] : vector<8x32xf32> to vector<8xf32>
    %4 = vector.shape_cast %3 : vector<8xf32> to vector<8x1xf32>
    %5 = arith.mulf %0, %0 : vector<8x32xf32>
    %cst_3 = arith.constant dense<0.000000e+00> : vector<8xf32>
    %6 = vector.multi_reduction <add>, %5, %cst_3 [1] : vector<8x32xf32> to vector<8xf32>
    %7 = vector.shape_cast %6 : vector<8xf32> to vector<8x1xf32>
    %8 = math.sqrt %7 : vector<8x1xf32>
    %9 = arith.mulf %1, %1 : vector<8x32xf32>
    %cst_4 = arith.constant dense<0.000000e+00> : vector<8xf32>
    %10 = vector.multi_reduction <add>, %9, %cst_4 [1] : vector<8x32xf32> to vector<8xf32>
    %11 = vector.shape_cast %10 : vector<8xf32> to vector<8x1xf32>
    %12 = math.sqrt %11 : vector<8x1xf32>
    %cst_5 = arith.constant 9.99999996E-13 : f32
    %13 = vector.broadcast %cst_5 : f32 to vector<8x1xf32>
    %14 = arith.maximumf %8, %13 : vector<8x1xf32>
    %cst_6 = arith.constant 9.99999996E-13 : f32
    %15 = vector.broadcast %cst_6 : f32 to vector<8x1xf32>
    %16 = arith.maximumf %12, %15 : vector<8x1xf32>
    %17 = arith.mulf %14, %16 : vector<8x1xf32>
    %cst_7 = arith.constant 0.000000e+00 : f32
    %18 = vector.broadcast %cst_7 : f32 to vector<8x1xf32>
    %19 = arith.subf %18, %4 : vector<8x1xf32>
    %20 = arith.divf %19, %17 : vector<8x1xf32>
    %21 = vector.shape_cast %20 : vector<8x1xf32> to vector<1x8xf32>
    %c0_8 = arith.constant 0 : index
    %c0_9 = arith.constant 0 : index
    %22 = vector.load %arg3[%c0_8, %c0_9] : memref<1x8xf32, #tpu.memory_space<vmem>>, vector<1x8xf32>
    tpu.vector_store %arg3[%c0_8, %c0_9], %21 {strides = array<i32>} : memref<1x8xf32, #tpu.memory_space<vmem>>, vector<1x8xf32>,
    return
  }
  func.func @transform_0(%arg0: i32) -> (i32, i32) {
    %c0_i32 = arith.constant 0 : i32
    %c0_i32_0 = arith.constant 0 : i32
    return %arg0, %c0_i32 : i32, i32
  }
  func.func @transform_1(%arg0: i32) -> (i32, i32) {
    %c0_i32 = arith.constant 0 : i32
    %c0_i32_0 = arith.constant 0 : i32
    return %arg0, %c0_i32 : i32, i32
  }
  func.func @transform_2(%arg0: i32) -> (i32, i32) {
    %c0_i32 = arith.constant 0 : i32
    %c0_i32_0 = arith.constant 0 : i32
    return %arg0, %c0_i32 : i32, i32
  }
}

</mosaic_0001>

<bundles_post_ra>
// kernel: neg_cosine_pallas.1
= control target key start
LH: loop header
LB: loop body
LE: loop exit
PB: predicated region body
PF: predicated region fallthrough
CT: control target
= control target key end

     0   :  { %7 = vsyncpa [#allocation3], 0  ;;  %s232_s0 = inlined_call_operand.hbm [shape: f32[8,32], index: 0, kind: input, shape index: {}]   ;;  %s233_s1 = inlined_call_operand.hbm [shape: f32[8,32], index: 1, kind: input, shape index: {}]   ;;  %s234_s2 = inlined_call_operand.hbm [shape: f32[1,8], index: 2, kind: output, shape index: {}]  }
   0x1   :  { %8 = vsyncpa [#allocation6], 0 }
   0x2   :  { %9 = vsyncpa [#allocation4], 0  ;;  %s178_s9 = smov [#allocation2]   ;;  %s179_s11 = smov [#allocation5]  }
   0x3   :  { %s16_s10 = sshll.u32 %s178_s9, 4  ;;  %s26_s12 = sshll.u32 %s179_s11, 4  ;;  %s17_s10 = int_to_ptr.vmem [resolvable:$true] %s16_s10  ;;  %s27_s12 = int_to_ptr.vmem [resolvable:$true] %s26_s12 }
   0x4   :  { %s106_s15 = scalar_lea.hbm %s232_s0, 128 }
   0x5   :  { %p107_p0 = scmp.ne.s32.totalorder %s232_s0, %s106_s15  ;;  %p110_p1 = scmp.lt.u32.totalorder %s106_s15, %s232_s0 }
   0x7   :  { %p112_p2 = pnand %p110_p1, %p107_p0 }
   0x9   :  { %115 = shalt.err (!%p112_p2)
}
   0xa   :  { %s116_s20 = scalar_lea.vmem %s17_s10, 128  ;;  %p121_p4 = scmp.lt.s32.totalorder %s17_s10, %s17_s10 }
   0xb   :  { %p117_p3 = scmp.ne.s32.totalorder %s17_s10, %s116_s20  ;;  %p122_p5 = scmp.lt.s32.totalorder %s116_s20, %s116_s20 }
   0xd   :  { %p123_p6 = por %p122_p5, %p121_p4 }
   0xf   :  { %p124_p7 = pnand %p123_p6, %p117_p3 }
  0x11   :  { %127 = shalt.err (!%p124_p7)
}
  0x12   :  { %19 = dma.hbm_to_vmem [thread:$0]  %s232_s0, 128, %s17_s10, [#allocation3]  }
  0x13   :  { %s128_s25 = scalar_lea.hbm %s233_s1, 128 }
  0x14   :  { %p129_p8 = scmp.ne.s32.totalorder %s233_s1, %s128_s25  ;;  %p132_p9 = scmp.lt.u32.totalorder %s128_s25, %s233_s1 }
  0x16   :  { %p134_p10 = pnand %p132_p9, %p129_p8 }
  0x18   :  { %137 = shalt.err (!%p134_p10)
}
  0x19   :  { %s138_s30 = scalar_lea.vmem %s27_s12, 128  ;;  %p143_p12 = scmp.lt.s32.totalorder %s27_s12, %s27_s12 }
  0x1a   :  { %p139_p11 = scmp.ne.s32.totalorder %s27_s12, %s138_s30  ;;  %p144_p13 = scmp.lt.s32.totalorder %s138_s30, %s138_s30 }
  0x1c   :  { %p145_p0 = por %p144_p13, %p143_p12 }
  0x1e   :  { %p146_p1 = pnand %p145_p0, %p139_p11 }
  0x20   :  { %149 = shalt.err (!%p146_p1)
}
  0x21   :  { %29 = dma.hbm_to_vmem [thread:$0]  %s233_s1, 128, %s27_s12, [#allocation6]  }
  0x22   :  { %172 = dma.done.wait [#allocation3], 128  }
  0x23   :  { %173 = vsyncadd [#allocation3], 4294967168 }
  0x24   :  { %174 = dma.done.wait [#allocation6], 128  }
  0x25   :  { %175 = vsyncadd [#allocation6], 4294967168  ;;  %v36_v0 = vld [vmem:[#allocation2] sm:$0xff]  ;;  %vm39_vm0 = vcmask 261120   ;;  %v37_v1 = vld [vmem:[#allocation5] sm:$0xff]  ;;  %v72_v23 = vlaneseq  ;;  %s180_s1 = smov [#allocation7]  }
  0x26   :  { %v43_v2 = vmul.f32 %v36_v0, %v36_v0  ;;  %v54_v3 = vmul.f32 %v37_v1, %v37_v1  ;;  %v38_v4 = vmul.f32 %v37_v1, %v36_v0  ;;  %s87_s4 = sshll.u32 %s180_s1, 4  ;;  %vm79_vm5 = vcmask 57344   ;;  %s88_s4 = int_to_ptr.vmem [resolvable:$true] %s87_s4 }
  0x27   :  { %v73_v25 = vand.u32 127, %v72_v23  ;;  %v75_v26 = vshrl.u32 %v72_v23, 7  ;;  %s150_s5 = scalar_lea.vmem %s88_s4, 16  ;;  %s154_s6 = scalar_lea.vmem %s88_s4, 32 }
  0x28   :  { %v44_v5 = vsel %vm39_vm0, %v43_v2, 0.0  ;;  %v40_v6 = vsel %vm39_vm0, %v38_v4, 0.0  ;;  %v55_v7 = vsel %vm39_vm0, %v54_v3, 0.0  ;;  %p151_p2 = scmp.ne.s32.totalorder %s88_s4, %s150_s5  ;;  %p155_p3 = scmp.lt.s32.totalorder %s88_s4, %s88_s4 }
  0x29   :  { %45 = vadd.xlane.f32.xlu0 %v44_v5  ;;  %41 = vadd.xlane.f32.xlu1 %v40_v6  ;;  %v76_v28 = vsub.s32 %v73_v25, %v75_v26  ;;  %p156_p4 = scmp.lt.s32.totalorder %s154_s6, %s150_s5 }
  0x2b   :  { %p157_p5 = por %p156_p4, %p155_p3 }
  0x2d   :  { %56 = vadd.xlane.f32.xlu0 %v55_v7  ;;  %p158_p6 = pnand %p157_p5, %p151_p2 }
  0xb6   :  { %v46_v8 = vpop.xlane.xlu0 %45  ;;  %v42_v24 = vpop.xlane.xlu1 %41 }
  0xb7   :  { %100 = vrsqrt.f32 %v46_v8  ;;  %vm49_vm1 = vcmp.eq.f32.partialorder %v46_v8, inf  ;;  %v52_v14 = vand.u32 2147483648, %v46_v8  ;;  %vm51_vm2 = vcmp.eq.f32.partialorder %v46_v8, 0.0 }
  0xb8   :  { %v68_v27 = vsub.f32 0.0, %v42_v24 }
  0xba   :  { %v57_v9 = vpop.xlane.xlu0 %56 }
  0xbb   :  { %102 = vrsqrt.f32 %v57_v9  ;;  %vm60_vm3 = vcmp.eq.f32.partialorder %v57_v9, inf  ;;  %v63_v17 = vand.u32 2147483648, %v57_v9  ;;  %vm62_vm4 = vcmp.eq.f32.partialorder %v57_v9, 0.0 }
  0xc1   :  { %v101_v10 = vpop.eup %100 }
  0xc2   :  { %v48_v11 = vmul.f32 %v101_v10, %v46_v8 }
  0xc4   :  { %v50_v12 = vsel %vm49_vm1, %v46_v8, %v48_v11 }
  0xc5   :  { %v103_v13 = vpop.eup %102  ;;  %v53_v16 = vsel %vm51_vm2, %v52_v14, %v50_v12 }
  0xc6   :  { %v59_v15 = vmul.f32 %v103_v13, %v57_v9  ;;  %v65_v20 = vmax.f32 %v53_v16, 1e-12 }
  0xc8   :  { %v61_v18 = vsel %vm60_vm3, %v57_v9, %v59_v15 }
  0xc9   :  { %v64_v19 = vsel %vm62_vm4, %v63_v17, %v61_v18 }
  0xca   :  { %v66_v21 = vmax.f32 %v64_v19, 1e-12 }
  0xcc   :  { %v67_v22 = vmul.f32 %v66_v21, %v65_v20 }
  0xce   :  { %104 = vrcp.f32 %v67_v22 }
  0xd8   :  { %v105_v29 = vpop.eup %104 }
  0xd9   :  { %v70_v30 = vmul.f32 %v105_v29, %v68_v27 }
  0xdb   :  { %v77_v31 = vrot.slane %v70_v30, %v76_v28 }
  0xdd   :  { %80 = vst.msk [vmem:[#allocation7] sm:$0x1] %vm79_vm5, %v77_v31 }
  0xde   :  { %161 = shalt.err (!%p158_p6)
}
  0xdf   :  { %s162_s9 = scalar_lea.hbm %s234_s2, 16 }
  0xe0   :  { %p163_p7 = scmp.ne.s32.totalorder %s234_s2, %s162_s9  ;;  %p166_p8 = scmp.lt.u32.totalorder %s162_s9, %s234_s2 }
  0xe2   :  { %p168_p9 = pnand %p166_p8, %p163_p7 }
  0xe4   :  { %171 = shalt.err (!%p168_p9)
}
  0xe5   :  { %90 = dma.vmem_to_hbm [thread:$0]  %s88_s4, 16, %s234_s2, [#allocation4]  }
  0xe6   :  { %176 = dma.done.wait [#allocation4], 16  }
  0xe7   :  { %177 = vsyncadd [#allocation4], 4294967280 }
  0xe8   :  { %94 = vsyncpa [#allocation3], 1 }
  0xe9   :  { %95 = vsyncpa [#allocation6], 1 }
  0xea   :  { %96 = vsyncpa [#allocation4], 1 }

</bundles_post_ra>
